<compile_context>
chip_gen: v5e
topology: v5e:2x2
jax: 0.10.0
libtpu: 0.0.40
codegen_flags: <defaults>
</compile_context>

<pallas_src>
import math

import jax
import jax.numpy as jnp
from jax.experimental import pallas as pl
from jax.experimental.pallas import tpu as pltpu

D_MODEL = 256
GEN_FEATURES = 10


# ---------------------------------------------------------------------------
# Small helpers.
# ---------------------------------------------------------------------------
def _round_up(x, m):
    return ((x + m - 1) // m) * m


def _largest_dividing_tile(total, tmax, granule):
    """Largest multiple of `granule` that divides `total` and is <= tmax."""
    best = granule
    t = granule
    cap = min(total, tmax)
    while t <= cap:
        if total % t == 0:
            best = t
        t += granule
    return min(best, total)


# ---------------------------------------------------------------------------
# Fused kernel: o = (x @ W1) @ W2 + b2'   (projector bias pre-folded into b2').
# h = x @ W1 is computed once per row tile (at j == 0) into VMEM scratch and
# reused for every head (j) tile; it never round-trips to HBM.
# ---------------------------------------------------------------------------
def _fused_proj_head_kernel(x_ref, w1_ref, w2_ref, b2_ref, o_ref, h_ref):
    # x:(tm,F)  w1:(F,D)  w2:(D,tn)  b2:(1,tn)  o:(tm,tn)  h scratch:(tm,D) f32
    @pl.when(pl.program_id(1) == 0)
    def _():
        h_ref[...] = jnp.dot(
            x_ref[...].astype(w1_ref.dtype), w1_ref[...],
            preferred_element_type=jnp.float32)

    # Cast h to the head-weight dtype (no-op for f32; enables bf16 weight stream
    # for the large pretrained-path heads with f32 accumulation).
    acc = jnp.dot(h_ref[...].astype(w2_ref.dtype), w2_ref[...],
                  preferred_element_type=jnp.float32)
    o_ref[...] = (acc + b2_ref[...]).astype(o_ref.dtype)


def fused_project_head(x, w1, w2, b2, *, tm_max=512, tn_max=1024):
    """y = (x @ w1) @ w2 + b2   with  x:(M,F)  w1:(F,D)  w2:(D,H)  b2:(1,H).

    `b2` must already contain the folded projector bias (b1 @ w2 + b2).
    Small heads (H <= tn_max) run as a single full-width tile -> no lane padding
    and no output slicing.  Large heads must be pre-padded to a multiple of 128
    once at init time and are tiled lane-dense.
    """
    M, F = x.shape
    F2, D = w1.shape
    D2, H = w2.shape
    assert F == F2 and D == D2 and b2.shape == (1, H)

    # Row tiling: a full-array block is exempt from the sublane-of-8 rule, so no
    # input padding when the whole batch fits in one row tile (the common case).
    if M <= tm_max:
        tm, Mp, x_in = M, M, x
    else:
        Mp = _round_up(M, 8)                       # pad rows to 8 only (no ~2x blow-up)
        x_in = jnp.pad(x, ((0, Mp - M), (0, 0))) if Mp != M else x
        tm = _largest_dividing_tile(Mp, tm_max, 8)

    # Head tiling: one full-width tile when it fits (no pad / no slice);
    # otherwise lane-dense 128-multiples (head must be pre-padded at init).
    if H <= tn_max:
        tn = H
    else:
        if H % 128:
            raise ValueError(
                "large heads must be pre-padded to a multiple of 128 at init")
        tn = _largest_dividing_tile(H, tn_max, 128)

    grid = (Mp // tm, H // tn)

    out = pl.pallas_call(
        _fused_proj_head_kernel,
        out_shape=jax.ShapeDtypeStruct((Mp, H), x.dtype),
        grid_spec=pltpu.PrefetchScalarGridSpec(
            num_scalar_prefetch=0,
            grid=grid,
            in_specs=[
                pl.BlockSpec((tm, F), lambda i, j: (i, 0)),   # pooled-token rows
                pl.BlockSpec((F, D), lambda i, j: (0, 0)),    # projector weight (resident)
                pl.BlockSpec((D, tn), lambda i, j: (0, j)),   # head weight tile
                pl.BlockSpec((1, tn), lambda i, j: (0, j)),   # folded head bias tile
            ],
            out_specs=pl.BlockSpec((tm, tn), lambda i, j: (i, j)),
            scratch_shapes=[pltpu.VMEM((tm, D), jnp.float32)],
        ),
        compiler_params=pltpu.CompilerParams(
            # i (rows): independent -> megacore sharding when the grid has >1 row
            # tile.  j (head tiles): h scratch is carried across j -> "arbitrary".
            dimension_semantics=("parallel", "arbitrary"),
        ),
    )(x_in, w1, w2, b2)

    return out if Mp == M else out[:M]


# ---------------------------------------------------------------------------
# Parameter init (deterministic, PyTorch-nn.Linear-style uniform init).
# The projector bias is folded into each head bias ONCE here, so the kernel
# only needs (x@W1)@W2 + b2'.
# ---------------------------------------------------------------------------
def _init_linear(key, fan_in, fan_out):
    kw, kb = jax.random.split(key)
    bound = 1.0 / math.sqrt(float(fan_in))
    w = jax.random.uniform(kw, (fan_in, fan_out), jnp.float32, -bound, bound)
    b = jax.random.uniform(kb, (1, fan_out), jnp.float32, -bound, bound)
    return w, b


def init_params(key):
    keys = jax.random.split(key, 3)
    params = {}
    # generic_seq_projector: Linear(10, 256)
    params["gen_w"], params["gen_b"] = _init_linear(keys[0], GEN_FEATURES, D_MODEL)
    # regression_head: Linear(256, 1);  constraint_head: Linear(256, 81)
    params["reg_w"], params["reg_b"] = _init_linear(keys[1], D_MODEL, 1)
    params["con_w"], params["con_b"] = _init_linear(keys[2], D_MODEL, 81)
    # Fold the projector bias into each head bias:
    #   (x@W1 + b1)@W2 + b2  ==  (x@W1)@W2 + (b1@W2 + b2)   (exact algebra;
    #   only FP rounding order changes -- within test tolerance).
    for h in ("reg", "con"):
        params[h + "_b_fold"] = params["gen_b"] @ params[h + "_w"] + params[h + "_b"]
    # TODO(synk): vision_head(1000)/asr_head(32000)/text_head(2) belong to the
    #             checkpoint-backed pretrained-encoder branches; when added,
    #             pre-pad their widths to 128-multiples and store bf16 weights.
    return params


# ---------------------------------------------------------------------------
# Forward pass (generic pillar path).
# ---------------------------------------------------------------------------
def baseline_forward(params, data, pillar_id):
    if pillar_id in (1, 2, 4, 5, 8, 10):
        # TODO(synk): pretrained encoder paths not reproduced (see header).
        raise NotImplementedError("pretrained encoder paths not reproduced")

    if data.ndim == 2:
        data = data[:, None, :]                  # torch .unsqueeze(1) -> (B, 1, 10)

    # core_model is identity here and the heads consume core_output[:, 0, :], so
    # only token 0 needs projecting (S-fold work reduction, numerics unchanged).
    x0 = data[:, 0, :]                           # (B, 10)

    head = "con" if pillar_id == 7 else "reg"
    return fused_project_head(
        x0, params["gen_w"], params[head + "_w"], params[head + "_b_fold"])


# Pure-JAX reference (un-folded bias order, i.e. exactly the nn.Linear chain).
def baseline_forward_ref(params, data, pillar_id):
    if data.ndim == 2:
        data = data[:, None, :]
    proj = data @ params["gen_w"] + params["gen_b"]
    pooled = proj[:, 0, :]
    head = "con" if pillar_id == 7 else "reg"
    return pooled @ params[head + "_w"] + params[head + "_b"]


if __name__ == "__main__":
    key = jax.random.PRNGKey(0)
    k_param, k_data = jax.random.split(key)

    params = init_params(k_param)

    # generic-pillar input: batch=2, feature dim 10 (matches Linear(10, d_model))
    data = jax.random.normal(k_data, (2, GEN_FEATURES), dtype=jnp.float32)

    # pillar_id == 7 -> constraint head (B, 81)
    out_constraint = baseline_forward(params, data, pillar_id=7)
    # any other generic pillar (e.g. 3) -> regression head (B, 1)
    out_regression = baseline_forward(params, data, pillar_id=3)

    jax.block_until_ready((out_constraint, out_regression))

    assert out_constraint.shape == (2, 81), out_constraint.shape
    assert out_regression.shape == (2, 1), out_regression.shape

    ref_c = baseline_forward_ref(params, data, 7)
    ref_r = baseline_forward_ref(params, data, 3)
    assert jnp.allclose(out_constraint, ref_c, atol=5e-5, rtol=1e-5)
    assert jnp.allclose(out_regression, ref_r, atol=5e-5, rtol=1e-5)

    print("KERNEL_OK")
</pallas_src>

<mosaic_0001>
module attributes {stable_mosaic.version = 11 : i64} {
  func.func @_fused_proj_head_kernel(%arg0: i32, %arg1: i32, %arg2: memref<2x10xf32, #tpu.memory_space<vmem>>, %arg3: memref<10x256xf32, #tpu.memory_space<vmem>>, %arg4: memref<256x81xf32, #tpu.memory_space<vmem>>, %arg5: memref<1x81xf32, #tpu.memory_space<vmem>>, %arg6: memref<2x81xf32, #tpu.memory_space<vmem>>, %arg7: memref<2x256xf32, #tpu.memory_space<vmem>>) attributes {dimension_semantics = [#tpu.dimension_semantics<parallel>, #tpu.dimension_semantics<arbitrary>], iteration_bounds = array<i64: 1, 1>, scalar_prefetch = 0 : i64, scratch_operands = 1 : i64, tpu.core_type = #tpu.core_type<tc>, window_params = [{transform_indices = @transform_0, window_bounds = array<i64: 2, 10>}, {pipeline_mode = #tpu.pipeline_mode<synchronous>, transform_indices = @transform_1, window_bounds = array<i64: 10, 256>}, {transform_indices = @transform_2, window_bounds = array<i64: 256, 81>}, {transform_indices = @transform_3, window_bounds = array<i64: 1, 81>}, {transform_indices = @transform_4, window_bounds = array<i64: 2, 81>}]} {
    %c0_i32 = arith.constant 0 : i32
    %0 = arith.cmpi eq, %arg1, %c0_i32 : i32
    %1 = arith.extui %0 : i1 to i32
    %c0_i32_0 = arith.constant 0 : i32
    %2 = arith.cmpi ne, %1, %c0_i32_0 : i32
    scf.if %2 {
      %c0_8 = arith.constant 0 : index
      %c0_9 = arith.constant 0 : index
      %10 = vector.load %arg2[%c0_8, %c0_9] : memref<2x10xf32, #tpu.memory_space<vmem>>, vector<2x10xf32>
      %c0_10 = arith.constant 0 : index
      %c0_11 = arith.constant 0 : index
      %11 = vector.load %arg3[%c0_10, %c0_11] : memref<10x256xf32, #tpu.memory_space<vmem>>, vector<10x256xf32>
      %cst_12 = arith.constant dense<0.000000e+00> : vector<2x256xf32>
      %12 = tpu.matmul %10, %11, %cst_12 {dimension_numbers = #tpu.dot_dimension_numbers<[1], [0], [0], [1], [0, 0, 1, 1], [], []>} : vector<2x10xf32>, vector<10x256xf32>, vector<2x256xf32> -> vector<2x256xf32>
      %c0_13 = arith.constant 0 : index
      %c0_14 = arith.constant 0 : index
      %13 = vector.load %arg7[%c0_13, %c0_14] : memref<2x256xf32, #tpu.memory_space<vmem>>, vector<2x256xf32>
      tpu.vector_store %arg7[%c0_13, %c0_14], %12 {strides = array<i32>} : memref<2x256xf32, #tpu.memory_space<vmem>>, vector<2x256xf32>,
    } else {
    }
    %c0 = arith.constant 0 : index
    %c0_1 = arith.constant 0 : index
    %3 = vector.load %arg7[%c0, %c0_1] : memref<2x256xf32, #tpu.memory_space<vmem>>, vector<2x256xf32>
    %c0_2 = arith.constant 0 : index
    %c0_3 = arith.constant 0 : index
    %4 = vector.load %arg4[%c0_2, %c0_3] : memref<256x81xf32, #tpu.memory_space<vmem>>, vector<256x81xf32>
    %cst = arith.constant dense<0.000000e+00> : vector<2x81xf32>
    %5 = tpu.matmul %3, %4, %cst {dimension_numbers = #tpu.dot_dimension_numbers<[1], [0], [0], [1], [0, 0, 1, 1], [], []>} : vector<2x256xf32>, vector<256x81xf32>, vector<2x81xf32> -> vector<2x81xf32>
    %c0_4 = arith.constant 0 : index
    %c0_5 = arith.constant 0 : index
    %6 = vector.load %arg5[%c0_4, %c0_5] : memref<1x81xf32, #tpu.memory_space<vmem>>, vector<1x81xf32>
    %7 = vector.broadcast %6 : vector<1x81xf32> to vector<2x81xf32>
    %8 = arith.addf %5, %7 : vector<2x81xf32>
    %c0_6 = arith.constant 0 : index
    %c0_7 = arith.constant 0 : index
    %9 = vector.load %arg6[%c0_6, %c0_7] : memref<2x81xf32, #tpu.memory_space<vmem>>, vector<2x81xf32>
    tpu.vector_store %arg6[%c0_6, %c0_7], %8 {strides = array<i32>} : memref<2x81xf32, #tpu.memory_space<vmem>>, vector<2x81xf32>,
    return
  }
  func.func @transform_0(%arg0: i32, %arg1: i32) -> (i32, i32) {
    %c0_i32 = arith.constant 0 : i32
    %c0_i32_0 = arith.constant 0 : i32
    return %arg0, %c0_i32 : i32, i32
  }
  func.func @transform_1(%arg0: i32, %arg1: i32) -> (i32, i32) {
    %c0_i32 = arith.constant 0 : i32
    %c0_i32_0 = arith.constant 0 : i32
    %c0_i32_1 = arith.constant 0 : i32
    return %c0_i32, %c0_i32_0 : i32, i32
  }
  func.func @transform_2(%arg0: i32, %arg1: i32) -> (i32, i32) {
    %c0_i32 = arith.constant 0 : i32
    %c0_i32_0 = arith.constant 0 : i32
    return %c0_i32, %arg1 : i32, i32
  }
  func.func @transform_3(%arg0: i32, %arg1: i32) -> (i32, i32) {
    %c0_i32 = arith.constant 0 : i32
    %c0_i32_0 = arith.constant 0 : i32
    return %c0_i32, %arg1 : i32, i32
  }
  func.func @transform_4(%arg0: i32, %arg1: i32) -> (i32, i32) {
    %c0_i32 = arith.constant 0 : i32
    return %arg0, %arg1 : i32, i32
  }
}

</mosaic_0001>

<bundles_post_ra>
// kernel: tpu_custom_call.1
= control target key start
LH: loop header
LB: loop body
LE: loop exit
PB: predicated region body
PF: predicated region fallthrough
CT: control target
= control target key end

     0   :  { %vm31_vm0 = vcmask 1041408   ;;  %vm27_vm1 = vcmask 80896   ;;  %s363_s0 = inlined_call_operand.vmem [shape: f32[2,10], index: 0, kind: input, shape index: {}]   ;;  %s364_s1 = inlined_call_operand.vmem [shape: f32[10,256], index: 1, kind: input, shape index: {}]   ;;  %s365_s2 = inlined_call_operand.vmem [shape: f32[256,81], index: 2, kind: input, shape index: {}]   ;;  %s366_s3 = inlined_call_operand.vmem [shape: f32[1,81], index: 3, kind: input, shape index: {}]   ;;  %s367_s4 = inlined_call_operand.hbm [shape: f32[2,81], index: 4, kind: output, shape index: {}]  }
   0x1   :  { %v26_v0 = vld [vmem:[%s364_s1 + $0x18] sm:$0x3]  ;;  %v25_v1 = vld [vmem:[%s364_s1 + $0x10] sm:$0x3]  ;;  %v24_v2 = vld [vmem:[%s364_s1 + $0x8] sm:$0xff] }
   0x2   :  { %187 = vmatpush.msk.msra.mxu1 %vm31_vm0, %v26_v0  ;;  %185 = vmatpush.msk.msra.mxu0 %vm31_vm0, %v25_v1  ;;  %v22_v3 = vld [vmem:[%s363_s0] sm:$0x3]  ;;  %v100_v5 = vld [vmem:[%s365_s2 + $0x78] sm:$0xff]  ;;  %v99_v7 = vld [vmem:[%s365_s2 + $0x70] sm:$0xff] }
   0x3   :  { %v23_v4 = vld [vmem:[%s364_s1] sm:$0xff]  ;;  %127 = vmatpush.msra.mxu2 %v100_v5  ;;  %v116_v6 = vld [vmem:[%s365_s2 + $0xf8] sm:$0xff]  ;;  %v115_v8 = vld [vmem:[%s365_s2 + $0xf0] sm:$0xff] }
   0x4   :  { %73 = vmatpush.msra.mxu1 %v24_v2  ;;  %53 = vmatpush.msra.mxu0 %v23_v4  ;;  %v98_v9 = vld [vmem:[%s365_s2 + $0x68] sm:$0xff]  ;;  %v97_v11 = vld [vmem:[%s365_s2 + $0x60] sm:$0xff] }
   0x5   :  { %188 = vmatmul.msk.f32.vlgmr.msra.gmra.mxu1 %vm27_vm1, %v22_v3  ;;  %186 = vmatmul.msk.f32.vlgmr.msra.gmra.mxu0 %vm27_vm1, %v22_v3  ;;  %v114_v10 = vld [vmem:[%s365_s2 + $0xe8] sm:$0xff] }
   0x6   :  { %147 = vmatpush.msra.mxu3 %v116_v6  ;;  %128 = vmatpush.msra.mxu2 %v99_v7 }
   0x7   :  { %9 = vsyncpa [#allocation4], 0  ;;  %v113_v12 = vld [vmem:[%s365_s2 + $0xe0] sm:$0xff]  ;;  %v96_v13 = vld [vmem:[%s365_s2 + $0x58] sm:$0xff]  ;;  %s176_s10 = sshll.u32 %s367_s4, 4  ;;  %vm167_vm2 = vcmask 656384   ;;  %s177_s10 = int_to_ptr.hbm [resolvable:$true] %s176_s10 }
   0x8   :  { %148 = vmatpush.msra.mxu3 %v115_v8  ;;  %129 = vmatpush.msra.mxu2 %v98_v9  ;;  %v112_v14 = vld [vmem:[%s365_s2 + $0xd8] sm:$0xff]  ;;  %v95_v15 = vld [vmem:[%s365_s2 + $0x50] sm:$0xff]  ;;  %v94_v17 = vld [vmem:[%s365_s2 + $0x48] sm:$0xff] }
   0x9   :  { %v111_v16 = vld [vmem:[%s365_s2 + $0xd0] sm:$0xff]  ;;  %v110_v18 = vld [vmem:[%s365_s2 + $0xc8] sm:$0xff]  ;;  %v93_v19 = vld [vmem:[%s365_s2 + $0x40] sm:$0xff] }
   0xa   :  { %149 = vmatpush.msra.mxu3 %v114_v10  ;;  %130 = vmatpush.msra.mxu2 %v97_v11  ;;  %v109_v20 = vld [vmem:[%s365_s2 + $0xc0] sm:$0xff]  ;;  %v92_v21 = vld [vmem:[%s365_s2 + $0x38] sm:$0xff]  ;;  %v91_v23 = vld [vmem:[%s365_s2 + $0x30] sm:$0xff] }
   0xb   :  { %v108_v22 = vld [vmem:[%s365_s2 + $0xb8] sm:$0xff]  ;;  %v107_v24 = vld [vmem:[%s365_s2 + $0xb0] sm:$0xff]  ;;  %v90_v25 = vld [vmem:[%s365_s2 + $0x28] sm:$0xff] }
   0xc   :  { %150 = vmatpush.msra.mxu3 %v113_v12  ;;  %131 = vmatpush.msra.mxu2 %v96_v13  ;;  %v106_v26 = vld [vmem:[%s365_s2 + $0xa8] sm:$0xff]  ;;  %v89_v27 = vld [vmem:[%s365_s2 + $0x20] sm:$0xff]  ;;  %v88_v29 = vld [vmem:[%s365_s2 + $0x18] sm:$0xff] }
   0xd   :  { %v105_v28 = vld [vmem:[%s365_s2 + $0xa0] sm:$0xff]  ;;  %v104_v30 = vld [vmem:[%s365_s2 + $0x98] sm:$0xff]  ;;  %v87_v31 = vld [vmem:[%s365_s2 + $0x10] sm:$0xff] }
   0xe   :  { %151 = vmatpush.msra.mxu3 %v112_v14  ;;  %132 = vmatpush.msra.mxu2 %v95_v15  ;;  %v103_v32 = vld [vmem:[%s365_s2 + $0x90] sm:$0xff]  ;;  %v86_v33 = vld [vmem:[%s365_s2 + $0x8] sm:$0xff]  ;;  %v85_v35 = vld [vmem:[%s365_s2] sm:$0xff] }
   0xf   :  { %v102_v34 = vld [vmem:[%s365_s2 + $0x88] sm:$0xff]  ;;  %v101_v36 = vld [vmem:[%s365_s2 + $0x80] sm:$0xff]  ;;  %s217_s2 = smov [#allocation3]  }
  0x10   :  { %152 = vmatpush.msra.mxu3 %v111_v16  ;;  %133 = vmatpush.msra.mxu2 %v94_v17  ;;  %v190_v44 = vld [vmem:[%s366_s3] ss:$0 sm:$0xff]  ;;  %s174_s7 = sshll.u32 %s217_s2, 4  ;;  %s175_s7 = int_to_ptr.vmem [resolvable:$true] %s174_s7 }
  0x12   :  { %153 = vmatpush.msra.mxu3 %v110_v18  ;;  %134 = vmatpush.msra.mxu2 %v93_v19 }
  0x14   :  { %154 = vmatpush.msra.mxu3 %v109_v20  ;;  %135 = vmatpush.msra.mxu2 %v92_v21 }
  0x16   :  { %155 = vmatpush.msra.mxu3 %v108_v22  ;;  %136 = vmatpush.msra.mxu2 %v91_v23 }
  0x18   :  { %156 = vmatpush.msra.mxu3 %v107_v24  ;;  %137 = vmatpush.msra.mxu2 %v90_v25 }
  0x1a   :  { %157 = vmatpush.msra.mxu3 %v106_v26  ;;  %138 = vmatpush.msra.mxu2 %v89_v27 }
  0x1c   :  { %158 = vmatpush.msra.mxu3 %v105_v28  ;;  %139 = vmatpush.msra.mxu2 %v88_v29 }
  0x1e   :  { %159 = vmatpush.msra.mxu3 %v104_v30  ;;  %140 = vmatpush.msra.mxu2 %v87_v31 }
  0x20   :  { %160 = vmatpush.msra.mxu3 %v103_v32  ;;  %141 = vmatpush.msra.mxu2 %v86_v33 }
  0x22   :  { %161 = vmatpush.msra.mxu3 %v102_v34  ;;  %142 = vmatpush.msra.mxu2 %v85_v35 }
  0x24   :  { %162 = vmatpush.msra.mxu3 %v101_v36 }
  0x82   :  { %v75_v37 = vpop.f32.mrf.mxu1  ;;  %v55_v38 = vpop.f32.mrf.mxu0 }
  0x83   :  { %v80_v39 = vrot.slane %v75_v37, 6 }
  0x85   :  { %v81_v40 = vsel %vm31_vm0, %v55_v38, %v80_v39 }
  0x86   :  { %83 = vst [vmem:[#allocation2] sm:$0xf] %v81_v40 }
  0x8d   :  { %v84_v41 = vld [vmem:[#allocation2] sm:$0xf] }
  0x8e   :  { %122 = vst [vmem:[#allocation1] ss:$4 sm:$0xff] %v84_v41 }
  0x95   :  { %v123_v42 = vld.sshfl [vmem:[#allocation1] sm:$0xff pattern:$0x73625140]  ;;  %v124_v43 = vld.sshfl [vmem:[#allocation1 + $0x8] sm:$0xff pattern:$0x73625140] }
  0x96   :  { %143 = vmatmul.f32.vlgmr.msra.gmra.mxu2 %v123_v42  ;;  %163 = vmatmul.f32.vlgmr.msra.gmra.mxu3 %v124_v43 }
 0x119   :  { %v144_v45 = vpop.f32.mrf.mxu2  ;;  %v164_v47 = vpop.f32.mrf.mxu3 }
 0x11a   :  { %v145_v46 = vadd.f32 %v190_v44, %v144_v45 }
 0x11c   :  { %v165_v48 = vadd.f32 %v164_v47, %v145_v46 }
 0x11e   :  { %168 = vst.msk [vmem:[#allocation3] sm:$0x3] %vm167_vm2, %v165_v48 }
 0x11f   :  { %179 = dma.vmem_to_hbm [thread:$0]  %s175_s7, 32, %s177_s10, [#allocation4]  }
 0x120   :  { %215 = dma.done.wait [#allocation4], 32  }
 0x121   :  { %216 = vsyncadd [#allocation4], 4294967264 }
 0x122   :  { %184 = vsyncpa [#allocation4], 1 }

</bundles_post_ra>
